<compile_context>
chip_gen: v7x
topology: tpu7x:2x2x1
jax: 0.10.0
libtpu: 0.0.40
codegen_flags: <defaults>
</compile_context>

<pallas_src>
import jax
import jax.numpy as jnp
from jax.experimental import pallas as pl
from jax.experimental.pallas import tpu as pltpu

LANE = 128
SUBLANE = 8
NUM_CORES = 2                        # megacore split (v7x); harmless on 1-TC chips
VMEM_BUDGET = 8 * 1024 * 1024        # explicit blocks + accumulator budget
VMEM_LIMIT = 32 * 1024 * 1024        # scoped-VMEM limit (<= physical on all gens)
MAX_BLOCK_ROWS = 8192                # absolute cap on (rows, 128) block height


def _round_up(x, m):
    return ((x + m - 1) // m) * m


def _cdiv(a, b):
    return -(-a // b)


def _compiler_params():
    return pltpu.CompilerParams(
        dimension_semantics=("parallel", "arbitrary"),
        vmem_limit_bytes=VMEM_LIMIT)


# ----------------------------------------------------------------------------
# Kernel A: flat (rows, 128) streaming sum of |pred - target| (* weight).
# Grid = (ncores, blocks_per_core); per-core partial sums written to SMEM.
# ----------------------------------------------------------------------------
def _make_flat_kernel(block_rows, rows_kernel, blocks_per_core, n_blocks,
                      weighted, needs_mask):

    def _accumulate(nacc, nc, g):
        if not needs_mask:
            nacc[...] += nc
            return

        # Only the tail block (g == n_blocks-1) and clamped duplicate blocks
        # (g >= n_blocks) need masking; keep the hot path VALU-lean.
        @pl.when(g < n_blocks - 1)
        def _():
            nacc[...] += nc

        @pl.when(g >= n_blocks - 1)
        def _():
            remaining = rows_kernel - g * block_rows   # <= 0 for duplicates
            row_ids = jax.lax.broadcasted_iota(jnp.int32, (block_rows, LANE), 0)
            nacc[...] += jnp.where(row_ids < remaining, nc, 0.0)

    if weighted:
        def kernel(pred_ref, tgt_ref, w_ref, num_ref, nacc):
            c = pl.program_id(0)
            i = pl.program_id(1)

            @pl.when(i == 0)
            def _():
                nacc[...] = jnp.zeros_like(nacc)

            p = pred_ref[...].astype(jnp.float32)
            t = tgt_ref[...].astype(jnp.float32)
            w = w_ref[...].astype(jnp.float32)
            _accumulate(nacc, jnp.abs(p - t) * w, c * blocks_per_core + i)

            @pl.when(i == pl.num_programs(1) - 1)
            def _():
                num_ref[0, 0] = jnp.sum(nacc[...])      # single final reduce

        return kernel

    def kernel(pred_ref, tgt_ref, num_ref, nacc):
        c = pl.program_id(0)
        i = pl.program_id(1)

        @pl.when(i == 0)
        def _():
            nacc[...] = jnp.zeros_like(nacc)

        p = pred_ref[...].astype(jnp.float32)
        t = tgt_ref[...].astype(jnp.float32)
        _accumulate(nacc, jnp.abs(p - t), c * blocks_per_core + i)

        @pl.when(i == pl.num_programs(1) - 1)
        def _():
            num_ref[0, 0] = jnp.sum(nacc[...])

    return kernel


def _streaming_abs_sum(pred_flat, tgt_flat, w_flat=None):
    """sum(|pred - tgt| (* w)) over flat 1-D arrays via the flat kernel."""
    n_elem = int(pred_flat.shape[0])
    n_aligned = (n_elem // LANE) * LANE
    rows_kernel = n_aligned // LANE

    # Ragged (<128 element) tail summed host-side -- avoids a full-tensor pad.
    tail_sum = jnp.float32(0.0)
    if n_aligned < n_elem:
        tp = pred_flat[n_aligned:].astype(jnp.float32)
        tt = tgt_flat[n_aligned:].astype(jnp.float32)
        tnc = jnp.abs(tp - tt)
        if w_flat is not None:
            tnc = tnc * w_flat[n_aligned:].astype(jnp.float32)
        tail_sum = jnp.sum(tnc)

    if rows_kernel == 0:
        return tail_sum

    weighted = w_flat is not None
    inputs = [pred_flat[:n_aligned].reshape(rows_kernel, LANE),
              tgt_flat[:n_aligned].reshape(rows_kernel, LANE)]
    if weighted:
        inputs.append(w_flat[:n_aligned].reshape(rows_kernel, LANE))

    # Largest lane-dense block that keeps double-buffered inputs plus the f32
    # accumulator inside the budget (fits every generation's default, and we
    # raise vmem_limit_bytes for elementwise temporaries anyway).
    bytes_per_row = sum(2 * LANE * x.dtype.itemsize for x in inputs)  # dbl-buf
    bytes_per_row += LANE * 4                                         # f32 acc
    cap_rows = max(SUBLANE, (VMEM_BUDGET // bytes_per_row) // SUBLANE * SUBLANE)
    cap_rows = min(cap_rows, MAX_BLOCK_ROWS)
    if rows_kernel <= SUBLANE:
        block_rows = rows_kernel          # full-extent block, no 8-divisibility
    else:
        block_rows = min(cap_rows, (rows_kernel // SUBLANE) * SUBLANE)

    n_blocks = _cdiv(rows_kernel, block_rows)
    ncores = NUM_CORES if n_blocks >= NUM_CORES else 1
    blocks_per_core = _cdiv(n_blocks, ncores)
    needs_mask = (rows_kernel % block_rows != 0) or (blocks_per_core * ncores != n_blocks)

    def blk_idx(c, i):
        # Clamp: out-of-range (core, step) pairs re-read the last block; their
        # contribution is zeroed by the pl.when-gated row mask.
        return (jnp.minimum(c * blocks_per_core + i, n_blocks - 1), 0)

    in_spec = pl.BlockSpec((block_rows, LANE), blk_idx)
    out_spec = pl.BlockSpec((1, 1), lambda c, i: (c, 0), memory_space=pltpu.SMEM)

    kernel = _make_flat_kernel(block_rows, rows_kernel, blocks_per_core,
                               n_blocks, weighted, needs_mask)
    partials = pl.pallas_call(
        kernel,
        out_shape=jax.ShapeDtypeStruct((ncores, 1), jnp.float32),
        grid_spec=pltpu.PrefetchScalarGridSpec(
            num_scalar_prefetch=0,
            grid=(ncores, blocks_per_core),
            in_specs=[in_spec] * len(inputs),
            out_specs=out_spec,
            scratch_shapes=[pltpu.VMEM((block_rows, LANE), jnp.float32)]),
        compiler_params=_compiler_params(),
    )(*inputs)
    return jnp.sum(partials) + tail_sum


# ----------------------------------------------------------------------------
# Kernel B: channel-broadcast weighted sum, streaming the UN-broadcast weight.
# pred/target reshaped to (B, C, S); weight to (B, 1, S); grid = (B, S-blocks).
# ----------------------------------------------------------------------------
def _make_bcast_kernel(s_block, s_total, n_s, needs_mask):
    def kernel(pred_ref, tgt_ref, w_ref, num_ref, nacc):
        j = pl.program_id(1)

        @pl.when(j == 0)
        def _():
            nacc[...] = jnp.zeros_like(nacc)

        p = pred_ref[...].astype(jnp.float32)        # (1, C, s_block)
        t = tgt_ref[...].astype(jnp.float32)
        w = w_ref[...].astype(jnp.float32)           # (1, 1, s_block) -> bcast C
        nc = jnp.abs(p - t) * w

        if needs_mask:
            @pl.when(j < n_s - 1)
            def _():
                nacc[...] += nc

            @pl.when(j == n_s - 1)                   # lane-tail mask, cold path
            def _():
                remaining = s_total - j * s_block
                col = jax.lax.broadcasted_iota(jnp.int32, nc.shape, 2)
                nacc[...] += jnp.where(col < remaining, nc, 0.0)
        else:
            nacc[...] += nc

        @pl.when(j == pl.num_programs(1) - 1)
        def _():
            num_ref[0, 0] = jnp.sum(nacc[...])

    return kernel


def _channel_bcast_abs_sum(pred, target, weight):
    """sum(|pred - target| * weight) for weight of shape (B, 1, *spatial)."""
    B, C = pred.shape[0], pred.shape[1]
    S = 1
    for d in pred.shape[2:]:
        S *= d
    p3 = pred.reshape(B, C, S)
    t3 = target.reshape(B, C, S)
    w3 = weight.reshape(B, 1, S)

    # Per-lane-column bytes: double-buffered pred/tgt/weight blocks + f32 acc.
    per_col = (2 * C * (pred.dtype.itemsize + target.dtype.itemsize)
               + 2 * w3.dtype.itemsize + 4 * C)
    s_cap = max(LANE, (VMEM_BUDGET // per_col) // LANE * LANE)
    s_block = min(s_cap, S)                         # S % 128 == 0 (caller checks)
    n_s = _cdiv(S, s_block)
    needs_mask = (S % s_block) != 0

    kernel = _make_bcast_kernel(s_block, S, n_s, needs_mask)
    partials = pl.pallas_call(
        kernel,
        out_shape=jax.ShapeDtypeStruct((B, 1), jnp.float32),
        grid_spec=pltpu.PrefetchScalarGridSpec(
            num_scalar_prefetch=0,
            grid=(B, n_s),
            in_specs=[pl.BlockSpec((1, C, s_block), lambda b, j: (b, 0, j)),
                      pl.BlockSpec((1, C, s_block), lambda b, j: (b, 0, j)),
                      pl.BlockSpec((1, 1, s_block), lambda b, j: (b, 0, j))],
            out_specs=pl.BlockSpec((1, 1), lambda b, j: (b, 0),
                                   memory_space=pltpu.SMEM),
            scratch_shapes=[pltpu.VMEM((1, C, s_block), jnp.float32)]),
        compiler_params=_compiler_params(),
    )(p3, t3, w3)
    return jnp.sum(partials)


# ----------------------------------------------------------------------------
# Public wrapper matching the PyTorch module semantics.
# ----------------------------------------------------------------------------
def l1_loss_pallas(pred, target, weight=None, *, loss_weight=100.0,
                   reduction="mean", sample_wise=False):
    assert pred.shape == target.shape
    # TODO(synk): reduction='none' (elementwise output) not implemented here.
    assert reduction in ("mean", "sum")
    # TODO(synk): sample_wise=True mean path not implemented (module default is False).
    assert not sample_wise

    n_elem = int(pred.size)

    if weight is None:
        num_s = _streaming_abs_sum(pred.reshape(-1), target.reshape(-1))
        loss = num_s if reduction == "sum" else num_s / jnp.float32(n_elem)
        return jnp.float32(loss_weight) * loss

    w = weight
    if not jnp.issubdtype(w.dtype, jnp.floating):
        w = w.astype(jnp.float32)

    den_s = None
    if reduction == "mean":
        # Exact: each weight element is replicated (pred.size // weight.size)
        # times by the broadcast, so sum the small un-broadcast array.
        den_s = jnp.sum(w.astype(jnp.float32)) * jnp.float32(n_elem // int(w.size))

    S = 1
    for d in pred.shape[2:]:
        S *= d
    channel_bcast = (w.shape != pred.shape
                     and w.ndim == pred.ndim and pred.ndim >= 3
                     and w.shape[0] == pred.shape[0] and w.shape[1] == 1
                     and w.shape[2:] == pred.shape[2:])

    if channel_bcast and S % LANE == 0:
        num_s = _channel_bcast_abs_sum(pred, target, w)
    else:
        if w.shape != pred.shape:
            # TODO(synk): rare fallback (ragged spatial size or exotic broadcast)
            # still materialises the broadcast weight.
            w = jnp.broadcast_to(w, pred.shape)
        num_s = _streaming_abs_sum(pred.reshape(-1), target.reshape(-1),
                                   w.reshape(-1))

    if reduction == "sum":
        loss = num_s
    else:
        loss = num_s / (den_s + 1e-12)
    return jnp.float32(loss_weight) * loss


class L1Loss:
    """Pallas-backed equivalent of the PyTorch L1Loss module."""

    def __init__(self, loss_weight=100.0, reduction="mean", sample_wise=False):
        self.loss_weight = loss_weight
        self.reduction = reduction
        self.sample_wise = sample_wise

    def __call__(self, pred, target, weight=None, **kwargs):
        return l1_loss_pallas(pred, target, weight,
                              loss_weight=self.loss_weight,
                              reduction=self.reduction,
                              sample_wise=self.sample_wise)


if __name__ == "__main__":
    key = jax.random.PRNGKey(0)
    k1, k2, k3 = jax.random.split(key, 3)

    loss_mod = L1Loss(loss_weight=100.0, reduction="mean", sample_wise=False)

    def ref_loss(p, t, w=None, lw=100.0):
        l = jnp.abs(p.astype(jnp.float32) - t.astype(jnp.float32))
        if w is None:
            return lw * jnp.mean(l)
        wf = jnp.broadcast_to(w.astype(jnp.float32), l.shape)
        return lw * jnp.sum(l * wf) / (jnp.sum(wf) + 1e-12)

    # --- Test 1: small NCHW; unweighted, channel-mask, full-shape weight, bf16 ---
    B, C, H, W = 2, 4, 16, 16
    pred = jax.random.normal(k1, (B, C, H, W), dtype=jnp.float32)
    target = jax.random.normal(k2, (B, C, H, W), dtype=jnp.float32)
    mask = (jax.random.uniform(k3, (B, 1, H, W)) > 0.5).astype(jnp.float32)
    wfull = jax.random.uniform(k3, (B, C, H, W), dtype=jnp.float32)

    out = jax.block_until_ready(loss_mod(pred, target))
    assert jnp.allclose(out, ref_loss(pred, target), rtol=1e-5, atol=1e-5)

    out_w = jax.block_until_ready(loss_mod(pred, target, weight=mask))
    assert jnp.allclose(out_w, ref_loss(pred, target, mask), rtol=1e-5, atol=1e-5)

    out_wf = jax.block_until_ready(loss_mod(pred, target, weight=wfull))
    assert jnp.allclose(out_wf, ref_loss(pred, target, wfull), rtol=1e-5, atol=1e-5)

    pb, tb = pred.astype(jnp.bfloat16), target.astype(jnp.bfloat16)
    out_bf = jax.block_until_ready(loss_mod(pb, tb))
    assert jnp.allclose(out_bf, ref_loss(pb, tb), rtol=1e-4, atol=1e-4)

    # --- Test 2: multi-block flat path (tail + clamped duplicate blocks, 2-way
    # core split) and multi-block channel-broadcast weighted path -------------
    B2, C2, H2, W2 = 2, 4, 384, 384
    p2 = jax.random.normal(k1, (B2, C2, H2, W2), dtype=jnp.float32)
    t2 = jax.random.normal(k2, (B2, C2, H2, W2), dtype=jnp.float32)
    m2 = (jax.random.uniform(k3, (B2, 1, H2, W2)) > 0.5).astype(jnp.float32)

    o2 = jax.block_until_ready(loss_mod(p2, t2))
    assert jnp.allclose(o2, ref_loss(p2, t2), rtol=1e-4, atol=1e-4)
    o2w = jax.block_until_ready(loss_mod(p2, t2, weight=m2))
    assert jnp.allclose(o2w, ref_loss(p2, t2, m2), rtol=1e-4, atol=1e-4)

    # --- Test 3: element count not a multiple of 128 (ragged-tail handling) ---
    p3 = jax.random.normal(k1, (2, 3, 37, 23), dtype=jnp.float32)
    t3 = jax.random.normal(k2, (2, 3, 37, 23), dtype=jnp.float32)
    m3 = (jax.random.uniform(k3, (2, 1, 37, 23)) > 0.5).astype(jnp.float32)
    o3 = jax.block_until_ready(loss_mod(p3, t3))
    assert jnp.allclose(o3, ref_loss(p3, t3), rtol=1e-5, atol=1e-5)
    o3w = jax.block_until_ready(loss_mod(p3, t3, weight=m3))
    assert jnp.allclose(o3w, ref_loss(p3, t3, m3), rtol=1e-5, atol=1e-5)

    # --- Test 4: reduction='sum' with weight ---
    sum_mod = L1Loss(loss_weight=1.0, reduction="sum")
    os = jax.block_until_ready(sum_mod(pred, target, weight=mask))
    rsum = jnp.sum(jnp.abs(pred - target) * jnp.broadcast_to(mask, pred.shape))
    assert jnp.allclose(os, rsum, rtol=1e-5, atol=1e-5)

    print("KERNEL_OK")
</pallas_src>

<mosaic_0001>
module attributes {stable_mosaic.version = 11 : i64} {
  func.func @kernel(%arg0: i32, %arg1: i32, %arg2: memref<16x128xf32, #tpu.memory_space<vmem>>, %arg3: memref<16x128xf32, #tpu.memory_space<vmem>>, %arg4: memref<1x1xf32, #tpu.memory_space<smem>>, %arg5: memref<16x128xf32, #tpu.memory_space<vmem>>) attributes {dimension_semantics = [#tpu.dimension_semantics<parallel>, #tpu.dimension_semantics<arbitrary>], iteration_bounds = array<i64: 1, 1>, scalar_prefetch = 0 : i64, scratch_operands = 1 : i64, tpu.core_type = #tpu.core_type<tc>, window_params = [{transform_indices = @transform_0, window_bounds = array<i64: 16, 128>}, {transform_indices = @transform_1, window_bounds = array<i64: 16, 128>}, {transform_indices = @transform_2, window_bounds = array<i64: 1, 1>}]} {
    %c0_i32 = arith.constant 0 : i32
    %0 = arith.cmpi eq, %arg1, %c0_i32 : i32
    %1 = arith.extui %0 : i1 to i32
    %c0_i32_0 = arith.constant 0 : i32
    %2 = arith.cmpi ne, %1, %c0_i32_0 : i32
    scf.if %2 {
      %cst = arith.constant 0.000000e+00 : f32
      %13 = vector.broadcast %cst : f32 to vector<16x128xf32>
      %c0_10 = arith.constant 0 : index
      %c0_11 = arith.constant 0 : index
      %14 = vector.load %arg5[%c0_10, %c0_11] : memref<16x128xf32, #tpu.memory_space<vmem>>, vector<16x128xf32>
      tpu.vector_store %arg5[%c0_10, %c0_11], %13 {strides = array<i32>} : memref<16x128xf32, #tpu.memory_space<vmem>>, vector<16x128xf32>,
    } else {
    }
    %c0 = arith.constant 0 : index
    %c0_1 = arith.constant 0 : index
    %3 = vector.load %arg2[%c0, %c0_1] : memref<16x128xf32, #tpu.memory_space<vmem>>, vector<16x128xf32>
    %c0_2 = arith.constant 0 : index
    %c0_3 = arith.constant 0 : index
    %4 = vector.load %arg3[%c0_2, %c0_3] : memref<16x128xf32, #tpu.memory_space<vmem>>, vector<16x128xf32>
    %5 = arith.subf %3, %4 : vector<16x128xf32>
    %6 = math.absf %5 : vector<16x128xf32>
    %c0_4 = arith.constant 0 : index
    %c0_5 = arith.constant 0 : index
    %7 = vector.load %arg5[%c0_4, %c0_5] : memref<16x128xf32, #tpu.memory_space<vmem>>, vector<16x128xf32>
    %8 = arith.addf %7, %6 : vector<16x128xf32>
    %c0_6 = arith.constant 0 : index
    %c0_7 = arith.constant 0 : index
    %9 = vector.load %arg5[%c0_6, %c0_7] : memref<16x128xf32, #tpu.memory_space<vmem>>, vector<16x128xf32>
    tpu.vector_store %arg5[%c0_6, %c0_7], %8 {strides = array<i32>} : memref<16x128xf32, #tpu.memory_space<vmem>>, vector<16x128xf32>,
    %c0_i32_8 = arith.constant 0 : i32
    %10 = arith.cmpi eq, %arg1, %c0_i32_8 : i32
    %11 = arith.extui %10 : i1 to i32
    %c0_i32_9 = arith.constant 0 : i32
    %12 = arith.cmpi ne, %11, %c0_i32_9 : i32
    scf.if %12 {
      %c0_10 = arith.constant 0 : index
      %c0_11 = arith.constant 0 : index
      %13 = vector.load %arg5[%c0_10, %c0_11] : memref<16x128xf32, #tpu.memory_space<vmem>>, vector<16x128xf32>
      %14 = vector.shape_cast %13 : vector<16x128xf32> to vector<1x16x128xf32>
      %cst = arith.constant dense<0.000000e+00> : vector<1xf32>
      %15 = vector.multi_reduction <add>, %14, %cst [1, 2] : vector<1x16x128xf32> to vector<1xf32>
      %16 = vector.shape_cast %15 : vector<1xf32> to vector<1x1x1xf32>
      %17 = vector.extract %16[0, 0, 0] : f32 from vector<1x1x1xf32>
      %c0_12 = arith.constant 0 : index
      %c0_13 = arith.constant 0 : index
      %18 = memref.load %arg4[%c0_12, %c0_13] : memref<1x1xf32, #tpu.memory_space<smem>>
      memref.store %17, %arg4[%c0_12, %c0_13] : memref<1x1xf32, #tpu.memory_space<smem>>
    } else {
    }
    return
  }
  func.func @transform_0(%arg0: i32, %arg1: i32) -> (i32, i32) {
    %c1_i32 = arith.constant 1 : i32
    %0 = arith.muli %arg0, %c1_i32 : i32
    %1 = arith.addi %0, %arg1 : i32
    %c0_i32 = arith.constant 0 : i32
    %2 = arith.minsi %1, %c0_i32 : i32
    %c0_i32_0 = arith.constant 0 : i32
    %c0_i32_1 = arith.constant 0 : i32
    return %2, %c0_i32_0 : i32, i32
  }
  func.func @transform_1(%arg0: i32, %arg1: i32) -> (i32, i32) {
    %c1_i32 = arith.constant 1 : i32
    %0 = arith.muli %arg0, %c1_i32 : i32
    %1 = arith.addi %0, %arg1 : i32
    %c0_i32 = arith.constant 0 : i32
    %2 = arith.minsi %1, %c0_i32 : i32
    %c0_i32_0 = arith.constant 0 : i32
    %c0_i32_1 = arith.constant 0 : i32
    return %2, %c0_i32_0 : i32, i32
  }
  func.func @transform_2(%arg0: i32, %arg1: i32) -> (i32, i32) {
    %c0_i32 = arith.constant 0 : i32
    %c0_i32_0 = arith.constant 0 : i32
    return %arg0, %c0_i32 : i32, i32
  }
}

</mosaic_0001>

<bundles_post_ra>
// kernel: tpu_custom_call.1
= control target key start
LH: loop header
LB: loop body
LE: loop exit
PB: predicated region body
PF: predicated region fallthrough
CT: control target
= control target key end

     0   :  { %7 = vsyncpa [#allocation4], 0  ;;  %s239_s0 = inlined_call_operand.hbm [shape: f32[16,128], index: 0, kind: input, shape index: {}]   ;;  %s240_s1 = inlined_call_operand.hbm [shape: f32[16,128], index: 1, kind: input, shape index: {}]   ;;  %s241_s2 = inlined_call_operand.hbm [shape: f32[1,1], index: 2, kind: output, shape index: {}]  }
   0x1   :  { %8 = vsyncpa [#allocation7], 0 }
   0x2   :  { %9 = vsyncpa [#allocation5], 0  ;;  %s183_s9 = smov [#allocation3]   ;;  %s123_s13 = scalar_lea.hbm %s239_s0, 256 }
   0x3   :  { %s21_s10 = sshll.u32 %s183_s9, 4  ;;  %p124_p0 = scmp.ne.s32.totalorder %s239_s0, %s123_s13  ;;  %s22_s10 = int_to_ptr.vmem [resolvable:$true] %s21_s10 }
   0x4   :  { %p127_p1 = scmp.lt.u32.totalorder %s123_s13, %s239_s0 }
   0x6   :  { %p129_p2 = pnand %p127_p1, %p124_p0 }
   0x8   :  { %132 = shalt.err (!%p129_p2)
}
   0x9   :  { %s133_s18 = scalar_lea.vmem %s22_s10, 256  ;;  %p138_p4 = scmp.lt.s32.totalorder %s22_s10, %s22_s10 }
   0xa   :  { %p134_p3 = scmp.ne.s32.totalorder %s22_s10, %s133_s18  ;;  %p139_p5 = scmp.lt.s32.totalorder %s133_s18, %s133_s18 }
   0xc   :  { %p140_p6 = por %p139_p5, %p138_p4 }
   0xe   :  { %p141_p7 = pnand %p140_p6, %p134_p3 }
  0x10   :  { %144 = shalt.err (!%p141_p7)
}
  0x11   :  { %s184_s19 = smov 128   ;;  %s185_s20 = smov 8  }
  0x12   :  { %27 = dma.hbm_to_vmem [thread:$0]  %s239_s0, 256, %s22_s10, [#allocation4], %s184_s19, %s184_s19, %s185_s20  }
  0x13   :  { %s186_s23 = smov [#allocation6]   ;;  %s145_s27 = scalar_lea.hbm %s240_s1, 256 }
  0x14   :  { %s39_s24 = sshll.u32 %s186_s23, 4  ;;  %p146_p8 = scmp.ne.s32.totalorder %s240_s1, %s145_s27  ;;  %s40_s24 = int_to_ptr.vmem [resolvable:$true] %s39_s24 }
  0x15   :  { %p149_p9 = scmp.lt.u32.totalorder %s145_s27, %s240_s1 }
  0x17   :  { %p151_p10 = pnand %p149_p9, %p146_p8 }
  0x19   :  { %154 = shalt.err (!%p151_p10)
}
  0x1a   :  { %s155_s4 = scalar_lea.vmem %s40_s24, 256  ;;  %p160_p12 = scmp.lt.s32.totalorder %s40_s24, %s40_s24 }
  0x1b   :  { %p156_p11 = scmp.ne.s32.totalorder %s40_s24, %s155_s4  ;;  %p161_p13 = scmp.lt.s32.totalorder %s155_s4, %s155_s4 }
  0x1d   :  { %p162_p0 = por %p161_p13, %p160_p12 }
  0x1f   :  { %p163_p1 = pnand %p162_p0, %p156_p11 }
  0x21   :  { %166 = shalt.err (!%p163_p1)
}
  0x22   :  { %45 = dma.hbm_to_vmem [thread:$0]  %s240_s1, 256, %s40_s24, [#allocation7], %s184_s19, %s184_s19, %s185_s20  }
  0x23   :  { %177 = dma.done.wait [#allocation4], 256  }
  0x24   :  { %178 = vsyncadd [#allocation4], 4294967040 }
  0x25   :  { %179 = dma.done.wait [#allocation7], 256  }
  0x26   :  { %180 = vsyncadd [#allocation7], 4294967040  ;;  %v66_v0 = vld [vmem:[#allocation3] sm:$0xff]  ;;  %v67_v1 = vld [vmem:[#allocation3 + $0x8] sm:$0xff]  ;;  %s167_s8 = scalar_lea.hbm %s241_s2, 16 }
  0x27   :  { %v68_v2 = vld [vmem:[#allocation6] sm:$0xff]  ;;  %v69_v3 = vld [vmem:[#allocation6 + $0x8] sm:$0xff]  ;;  %p168_p2 = scmp.ne.s32.totalorder %s241_s2, %s167_s8  ;;  %p171_p3 = scmp.lt.u32.totalorder %s167_s8, %s241_s2 }
  0x28   :  { %v70_v4 = vsub.f32 %v66_v0, %v68_v2  ;;  %v71_v5 = vsub.f32 %v67_v1, %v69_v3 }
  0x29   :  { %p173_p4 = pnand %p171_p3, %p168_p2 }
  0x2a   :  { %v72_v6 = vand.u32 2147483647, %v70_v4  ;;  %v73_v7 = vand.u32 2147483647, %v71_v5 }
  0x2c   :  { %v85_v8 = vadd.f32 %v73_v7, %v72_v6 }
  0x2e   :  { %86 = vadd.xlane.f32.xlu0 %v85_v8 }
  0xbb   :  { %v87_v9 = vpop.xlane.xlu0 %86 }
  0xbc   :  { %v88_v10 = vrot.slane %v87_v9, 4 }
  0xbe   :  { %v89_v11 = vadd.f32 %v88_v10, %v87_v9 }
  0xc0   :  { %v90_v12 = vrot.slane %v89_v11, 2 }
  0xc2   :  { %v91_v13 = vadd.f32 %v90_v12, %v89_v11 }
  0xc4   :  { %v92_v14 = vrot.slane %v91_v13, 1 }
  0xc6   :  { %v93_v15 = vadd.f32 %v92_v14, %v91_v13 }
  0xc8   :  { %116 = vpush %v93_v15 }
  0xf9   :  { %s117_s1 = spop %116 }
  0xfa   :  { %96 = sst [smem:[#allocation8]] %s117_s1 }
  0xfb   :  { %176 = shalt.err (!%p173_p4)
}
  0xfc   :  { %s187_s13 = smov [#allocation8]  }
  0xfd   :  { %104 = dma.smem_to_hbm %s187_s13, 16, %s241_s2, [#allocation5]  }
  0xfe   :  { %181 = dma.done.wait [#allocation5], 16  }
  0xff   :  { %182 = vsyncadd [#allocation5], 4294967280 }
 0x100   :  { %108 = sfence }
 0x101   :  { %109 = vsyncpa [#allocation4], 1 }
 0x102   :  { %110 = vsyncpa [#allocation7], 1 }
 0x103   :  { %111 = vsyncpa [#allocation5], 1 }

</bundles_post_ra>
